<compile_context>
chip_gen: v5e
topology: v5e:2x2
jax: 0.10.0
libtpu: 0.0.40
codegen_flags: <defaults>
</compile_context>

<pallas_src>
import math

import jax
import jax.numpy as jnp
from jax.experimental import pallas as pl
from jax.experimental.pallas import tpu as pltpu


def _round_up(x, m):
    return ((x + m - 1) // m) * m


# ----------------------------------------------------------------------------
# Pallas kernel: fused 4-layer MLP + temperature scaling + sigmoid
# ----------------------------------------------------------------------------
def _mlp_kernel(x_ref, w1_ref, b1_ref, w2_ref, b2_ref, w3_ref, b3_ref,
                w4_ref, b4_ref, inv_temp_ref, out_ref):
    # x: bf16 [TB, D_pad]; weights bf16; biases f32; f32 accumulation on MXU.
    x = x_ref[...]

    h = jnp.dot(x, w1_ref[...], preferred_element_type=jnp.float32)
    h = jnp.maximum(h + b1_ref[...], 0.0)                         # ReLU

    h = jnp.dot(h.astype(jnp.bfloat16), w2_ref[...],
                preferred_element_type=jnp.float32)
    h = jnp.maximum(h + b2_ref[...], 0.0)

    h = jnp.dot(h.astype(jnp.bfloat16), w3_ref[...],
                preferred_element_type=jnp.float32)
    h = jnp.maximum(h + b3_ref[...], 0.0)

    o = jnp.dot(h.astype(jnp.bfloat16), w4_ref[...],
                preferred_element_type=jnp.float32)
    o = o + b4_ref[...]

    # unconstrained = mlp_out / clamped_temp ; constrained = sigmoid(...)
    inv_temp = inv_temp_ref[0, 0]
    out_ref[...] = jax.nn.sigmoid(o * inv_temp).astype(out_ref.dtype)


def fused_mlp_sigmoid(x_parts, kp, inv_temp, p_out, *, block_b=512):
    """x_parts: list of [B, d_i] feature blocks whose concat is the MLP input.

    Returns constrained params [B, p_out] f32.

    The padded bf16 [Bp, Dp] activation is assembled with one concat + pad
    (no zeros + .at[].set round-trip).  Weights/biases stay VMEM-resident via
    constant index maps; x/out tiles are pipelined over the batch grid.  The
    kernel output is bf16 (sigmoid outputs are in (0,1)) to cut HBM traffic;
    only the p_out real columns are sliced/cast back to f32.
    """
    B = x_parts[0].shape[0]
    D = sum(p.shape[1] for p in x_parts)
    Dp, W = kp["w1"].shape          # padded input dim, hidden width
    Pp = kp["w4"].shape[1]          # padded output dim (128)

    # Batch tile: multiple of 16 (bf16 native sublane tile).  If the whole
    # batch would fit a single tile, halve it so the grid has >= 2 steps and
    # the "parallel" axis can shard across both TensorCores on v7x.
    block_b = max(16, _round_up(block_b, 16))
    b16 = _round_up(B, 16)
    tb = min(block_b, b16)
    if tb >= 32 and b16 <= block_b:
        tb = _round_up(tb // 2, 16)
    Bp = _round_up(B, tb)

    # Single-pass assembly of the padded bf16 activation.
    x_cat = jnp.concatenate([p.astype(jnp.bfloat16) for p in x_parts], axis=1)
    x_pad = jnp.pad(x_cat, ((0, Bp - B), (0, Dp - D)))  # no-op when aligned

    fixed = lambda i: (0, 0)
    in_specs = [
        pl.BlockSpec((tb, Dp), lambda i: (i, 0)),   # x tile (pipelined)
        pl.BlockSpec((Dp, W), fixed), pl.BlockSpec((1, W), fixed),   # w1, b1
        pl.BlockSpec((W, W), fixed), pl.BlockSpec((1, W), fixed),    # w2, b2
        pl.BlockSpec((W, W), fixed), pl.BlockSpec((1, W), fixed),    # w3, b3
        pl.BlockSpec((W, Pp), fixed), pl.BlockSpec((1, Pp), fixed),  # w4, b4
        pl.BlockSpec(memory_space=pltpu.MemorySpace.SMEM),           # inv_temp
    ]
    out_specs = pl.BlockSpec((tb, Pp), lambda i: (i, 0))

    flops = 2 * Bp * (Dp * W + W * W + W * W + W * Pp)
    weight_bytes = 2 * (Dp * W + 2 * W * W + W * Pp)        # bf16 weights
    bias_bytes = 4 * (3 * W + Pp)                           # f32 biases
    bytes_accessed = (Bp * Dp * 2                            # x (bf16)
                      + weight_bytes + bias_bytes
                      + Bp * Pp * 2)                         # out (bf16)

    # Only set an explicit scoped-VMEM limit when the (conservatively
    # double-buffered) working set approaches the default limit (matters for
    # very large tb sweeps, and on v5e whose default is 16 MiB).
    vmem_est = (2 * tb * Dp * 2            # x, double-buffered bf16
                + 2 * tb * Pp * 2          # out, double-buffered bf16
                + 2 * (weight_bytes + bias_bytes)
                + (1 << 20))               # compiler staging headroom
    vmem_limit = None
    if vmem_est > (12 << 20):
        vmem_limit = min(_round_up(2 * vmem_est, 1 << 20), 96 << 20)

    out = pl.pallas_call(
        _mlp_kernel,
        out_shape=jax.ShapeDtypeStruct((Bp, Pp), jnp.bfloat16),
        grid=(Bp // tb,),
        in_specs=in_specs,
        out_specs=out_specs,
        compiler_params=pltpu.CompilerParams(
            dimension_semantics=("parallel",),
            vmem_limit_bytes=vmem_limit),
        cost_estimate=pl.CostEstimate(
            flops=flops, transcendentals=Bp * Pp,
            bytes_accessed=bytes_accessed),
    )(
        x_pad,
        kp["w1"], kp["b1"], kp["w2"], kp["b2"],
        kp["w3"], kp["b3"], kp["w4"], kp["b4"],
        inv_temp,
    )
    # Slice on the bf16 output (cheap: only p_out real lanes), then upcast.
    return out[:B, :p_out].astype(jnp.float32)


# ----------------------------------------------------------------------------
# Deterministic parameter construction (mirrors mlp.__init__ with
# init='xavier_uniform', activation='relu')
# ----------------------------------------------------------------------------
def _xavier_uniform(key, fan_in, fan_out, gain):
    bound = gain * math.sqrt(6.0 / (fan_in + fan_out))
    # stored as [in, out] (transposed relative to torch.nn.Linear.weight)
    return jax.random.uniform(key, (fan_in, fan_out), jnp.float32, -bound, bound)


def make_mlp_params(key, dims):
    """dims = (d_in, w, w, w, num_params); hidden layers get relu gain,
    output layer gets sigmoid gain (=1); all biases zero.  f32 master copy."""
    gain_relu = math.sqrt(2.0)
    gain_sigmoid = 1.0
    keys = jax.random.split(key, 4)
    params = {}
    for i in range(3):
        params[f"w{i+1}"] = _xavier_uniform(keys[i], dims[i], dims[i + 1], gain_relu)
        params[f"b{i+1}"] = jnp.zeros((1, dims[i + 1]), jnp.float32)
    params["w4"] = _xavier_uniform(keys[3], dims[3], dims[4], gain_sigmoid)
    params["b4"] = jnp.zeros((1, dims[4]), jnp.float32)
    return params


def make_kernel_params(p, d_in, d_pad, p_out, p_pad):
    """bf16 / lane-padded copies of the f32 master params for the kernel."""
    W = p["w1"].shape[1]
    kp = {}
    w1 = jnp.zeros((d_pad, W), jnp.float32).at[:d_in, :].set(p["w1"])
    kp["w1"] = w1.astype(jnp.bfloat16)
    kp["b1"] = p["b1"]                                  # f32 bias
    kp["w2"] = p["w2"].astype(jnp.bfloat16)
    kp["b2"] = p["b2"]
    kp["w3"] = p["w3"].astype(jnp.bfloat16)
    kp["b3"] = p["b3"]
    w4 = jnp.zeros((W, p_pad), jnp.float32).at[:, :p_out].set(p["w4"])
    kp["w4"] = w4.astype(jnp.bfloat16)
    kp["b4"] = jnp.zeros((1, p_pad), jnp.float32).at[:, :p_out].set(p["b4"])
    return kp


# ----------------------------------------------------------------------------
# mlp_wrapper forward (glue in plain JAX, hot path in the Pallas kernel)
# ----------------------------------------------------------------------------
class MLPWrapperPallas:
    def __init__(self, input_vars, var_idx_to_emb_dims, num_classes,
                 width=128, min_temp=10, max_temp=109,
                 vertical_mixing="none", key=jax.random.PRNGKey(0),
                 block_b=512):
        self.var_idx_to_emb_dims = dict(var_idx_to_emb_dims)  # idx -> emb_dim
        self.non_categorical_indices = sorted(
            set(range(input_vars)).difference(self.var_idx_to_emb_dims.keys()))
        self.min_temp = float(min_temp)
        self.max_temp = float(max_temp)
        self.block_b = block_b
        # para_index = arange(21) when vertical_mixing != 'simple_two_intercepts'
        self.num_params = 22 if vertical_mixing == "simple_two_intercepts" else 21

        new_input_size = len(self.non_categorical_indices)
        k_emb, k_mlp = jax.random.split(key)
        self.embeddings = {}
        ekeys = jax.random.split(k_emb, max(1, len(self.var_idx_to_emb_dims)))
        for j, (idx, emb_dim) in enumerate(sorted(self.var_idx_to_emb_dims.items())):
            # nn.Embedding default init: N(0, 1)
            self.embeddings[idx] = jax.random.normal(
                ekeys[j], (num_classes, emb_dim), jnp.float32)
            new_input_size += emb_dim
        self.new_input_size = new_input_size

        self.d_pad = _round_up(new_input_size, 128)
        self.p_pad = _round_up(self.num_params, 128)

        # f32 master parameters (semantics / reference), bf16 padded kernel copies.
        self.mlp_params_f32 = make_mlp_params(
            k_mlp, (new_input_size, width, width, width, self.num_params))
        self.kernel_params = make_kernel_params(
            self.mlp_params_f32, new_input_size, self.d_pad,
            self.num_params, self.p_pad)
        self.temp_sigmoid = jnp.float32(0.0)  # nn.Parameter(torch.tensor(0.0))

    def __call__(self, input_var, wosis_depth, coords, whether_predict):
        # predictor = input_var[:, :, 0, 0]   (NCHW-style [B, V, H, W] input)
        predictor = input_var[:, :, 0, 0]

        # categorical variables -> embedding lookup + L2 normalize (dim=1)
        embs = []
        for idx in sorted(self.var_idx_to_emb_dims.keys()):
            ids = predictor[:, idx].astype(jnp.int32)
            emb = jnp.take(self.embeddings[idx], ids, axis=0)
            norm = jnp.sqrt(jnp.sum(emb * emb, axis=1, keepdims=True))
            emb = emb / jnp.maximum(norm, 1e-12)              # F.normalize(p=2, dim=1)
            embs.append(emb)

        # non-categorical features (train_x=None -> no mean/std rescaling)
        features = predictor[:, jnp.array(self.non_categorical_indices)]

        # clamped_temp = min_temp + (max_temp - min_temp) * sigmoid(temp_sigmoid)
        clamped_temp = self.min_temp + (self.max_temp - self.min_temp) * \
            jax.nn.sigmoid(self.temp_sigmoid)
        inv_temp = jnp.reshape(1.0 / clamped_temp, (1, 1)).astype(jnp.float32)

        # hot path: MLP -> /temp -> sigmoid, all inside the Pallas kernel.
        # Feature parts are handed to the kernel wrapper un-concatenated so
        # cast + lane/batch padding fuse into a single assembly pass.
        constrained_params = fused_mlp_sigmoid(
            [features] + embs, self.kernel_params, inv_temp, self.num_params,
            block_b=self.block_b)

        predicted_para = constrained_params  # PRODA_para is None in this setup

        # TODO(synk): fun_model_prediction / fun_model_simu not provided; skip
        simu_soc = None
        return simu_soc, predicted_para


# ----------------------------------------------------------------------------
# Pure-JAX (f32) reference for correctness check
# ----------------------------------------------------------------------------
def reference_mlp(x, p, inv_temp):
    h = jnp.maximum(x @ p["w1"] + p["b1"], 0.0)
    h = jnp.maximum(h @ p["w2"] + p["b2"], 0.0)
    h = jnp.maximum(h @ p["w3"] + p["b3"], 0.0)
    o = h @ p["w4"] + p["b4"]
    return jax.nn.sigmoid(o * inv_temp[0, 0])


if __name__ == "__main__":
    key = jax.random.PRNGKey(0)
    k_model, k_data, k_cat, k_depth, k_coord = jax.random.split(key, 5)

    # small, module-consistent shapes
    B = 8                      # batch
    INPUT_VARS = 10            # total input variables
    H = W = 3                  # spatial dims of forcing (only [...,0,0] feeds the MLP)
    NUM_CLASSES = 5
    CAT_VARS = {7: 4, 8: 4}    # categorical var idx -> embedding dim
    WIDTH = 128

    model = MLPWrapperPallas(
        input_vars=INPUT_VARS,
        var_idx_to_emb_dims=CAT_VARS,
        num_classes=NUM_CLASSES,
        width=WIDTH,
        key=k_model,
    )

    # build input_var [B, V, H, W]; categorical channels hold integer class ids
    input_var = jax.random.normal(k_data, (B, INPUT_VARS, H, W), jnp.float32)
    cat_vals = jax.random.randint(k_cat, (B, len(CAT_VARS)), 0, NUM_CLASSES)
    for j, idx in enumerate(sorted(CAT_VARS.keys())):
        input_var = input_var.at[:, idx, :, :].set(
            cat_vals[:, j].astype(jnp.float32)[:, None, None])

    wosis_depth = jax.random.uniform(k_depth, (B, 5), jnp.float32, 0.0, 2.0)
    coords = jax.random.uniform(k_coord, (B, 2), jnp.float32, -90.0, 90.0)

    simu_soc, predicted_para = model(input_var, wosis_depth, coords, whether_predict=1)
    predicted_para = jax.block_until_ready(predicted_para)

    # sanity check against pure-JAX f32 reference of the kernelized hot path
    predictor = input_var[:, :, 0, 0]
    embs = []
    for idx in sorted(CAT_VARS.keys()):
        e = jnp.take(model.embeddings[idx], predictor[:, idx].astype(jnp.int32), axis=0)
        e = e / jnp.maximum(jnp.sqrt(jnp.sum(e * e, axis=1, keepdims=True)), 1e-12)
        embs.append(e)
    feats = predictor[:, jnp.array(model.non_categorical_indices)]
    x_ref = jnp.concatenate([feats] + embs, axis=1)
    clamped = 10.0 + (109.0 - 10.0) * jax.nn.sigmoid(jnp.float32(0.0))
    ref = reference_mlp(x_ref, model.mlp_params_f32,
                        jnp.reshape(1.0 / clamped, (1, 1)))

    assert predicted_para.shape == (B, 21), predicted_para.shape
    assert bool(jnp.all(jnp.isfinite(predicted_para)))
    # bf16 MXU inputs + bf16 kernel output (sigmoid in (0,1)) with f32
    # accumulation -> tolerance loosened vs f32 reference accordingly.
    assert bool(jnp.allclose(predicted_para, ref, atol=1e-2, rtol=5e-2)), (
        float(jnp.max(jnp.abs(predicted_para - ref))))

    print("KERNEL_OK")
</pallas_src>

<mosaic_0001>
module attributes {stable_mosaic.version = 11 : i64} {
  func.func @_mlp_kernel(%arg0: i32, %arg1: memref<16x128xbf16, #tpu.memory_space<vmem>>, %arg2: memref<128x128xbf16, #tpu.memory_space<vmem>>, %arg3: memref<1x128xf32, #tpu.memory_space<vmem>>, %arg4: memref<128x128xbf16, #tpu.memory_space<vmem>>, %arg5: memref<1x128xf32, #tpu.memory_space<vmem>>, %arg6: memref<128x128xbf16, #tpu.memory_space<vmem>>, %arg7: memref<1x128xf32, #tpu.memory_space<vmem>>, %arg8: memref<128x128xbf16, #tpu.memory_space<vmem>>, %arg9: memref<1x128xf32, #tpu.memory_space<vmem>>, %arg10: memref<1x1xf32, #tpu.memory_space<smem>>, %arg11: memref<16x128xbf16, #tpu.memory_space<vmem>>) attributes {dimension_semantics = [#tpu.dimension_semantics<parallel>], iteration_bounds = array<i64: 1>, scalar_prefetch = 0 : i64, scratch_operands = 0 : i64, tpu.core_type = #tpu.core_type<tc>, window_params = [{transform_indices = @transform_0, window_bounds = array<i64: 16, 128>}, {pipeline_mode = #tpu.pipeline_mode<synchronous>, transform_indices = @transform_1, window_bounds = array<i64: 128, 128>}, {pipeline_mode = #tpu.pipeline_mode<synchronous>, transform_indices = @transform_2, window_bounds = array<i64: 1, 128>}, {pipeline_mode = #tpu.pipeline_mode<synchronous>, transform_indices = @transform_3, window_bounds = array<i64: 128, 128>}, {pipeline_mode = #tpu.pipeline_mode<synchronous>, transform_indices = @transform_4, window_bounds = array<i64: 1, 128>}, {pipeline_mode = #tpu.pipeline_mode<synchronous>, transform_indices = @transform_5, window_bounds = array<i64: 128, 128>}, {pipeline_mode = #tpu.pipeline_mode<synchronous>, transform_indices = @transform_6, window_bounds = array<i64: 1, 128>}, {pipeline_mode = #tpu.pipeline_mode<synchronous>, transform_indices = @transform_7, window_bounds = array<i64: 128, 128>}, {pipeline_mode = #tpu.pipeline_mode<synchronous>, transform_indices = @transform_8, window_bounds = array<i64: 1, 128>}, {transform_indices = @transform_9, window_bounds = array<i64: 1, 1>}, {transform_indices = @transform_10, window_bounds = array<i64: 16, 128>}]} {
    %c0 = arith.constant 0 : index
    %c0_0 = arith.constant 0 : index
    %0 = vector.load %arg1[%c0, %c0_0] : memref<16x128xbf16, #tpu.memory_space<vmem>>, vector<16x128xbf16>
    %c0_1 = arith.constant 0 : index
    %c0_2 = arith.constant 0 : index
    %1 = vector.load %arg2[%c0_1, %c0_2] : memref<128x128xbf16, #tpu.memory_space<vmem>>, vector<128x128xbf16>
    %cst = arith.constant dense<0.000000e+00> : vector<16x128xf32>
    %2 = tpu.matmul %0, %1, %cst {dimension_numbers = #tpu.dot_dimension_numbers<[1], [0], [0], [1], [0, 0, 1, 1], [], []>} : vector<16x128xbf16>, vector<128x128xbf16>, vector<16x128xf32> -> vector<16x128xf32>
    %c0_3 = arith.constant 0 : index
    %c0_4 = arith.constant 0 : index
    %3 = vector.load %arg3[%c0_3, %c0_4] : memref<1x128xf32, #tpu.memory_space<vmem>>, vector<1x128xf32>
    %4 = vector.broadcast %3 : vector<1x128xf32> to vector<16x128xf32>
    %5 = arith.addf %2, %4 : vector<16x128xf32>
    %cst_5 = arith.constant 0.000000e+00 : f32
    %6 = vector.broadcast %cst_5 : f32 to vector<16x128xf32>
    %7 = arith.maximumf %5, %6 : vector<16x128xf32>
    %8 = arith.truncf %7 : vector<16x128xf32> to vector<16x128xbf16>
    %c0_6 = arith.constant 0 : index
    %c0_7 = arith.constant 0 : index
    %9 = vector.load %arg4[%c0_6, %c0_7] : memref<128x128xbf16, #tpu.memory_space<vmem>>, vector<128x128xbf16>
    %cst_8 = arith.constant dense<0.000000e+00> : vector<16x128xf32>
    %10 = tpu.matmul %8, %9, %cst_8 {dimension_numbers = #tpu.dot_dimension_numbers<[1], [0], [0], [1], [0, 0, 1, 1], [], []>} : vector<16x128xbf16>, vector<128x128xbf16>, vector<16x128xf32> -> vector<16x128xf32>
    %c0_9 = arith.constant 0 : index
    %c0_10 = arith.constant 0 : index
    %11 = vector.load %arg5[%c0_9, %c0_10] : memref<1x128xf32, #tpu.memory_space<vmem>>, vector<1x128xf32>
    %12 = vector.broadcast %11 : vector<1x128xf32> to vector<16x128xf32>
    %13 = arith.addf %10, %12 : vector<16x128xf32>
    %cst_11 = arith.constant 0.000000e+00 : f32
    %14 = vector.broadcast %cst_11 : f32 to vector<16x128xf32>
    %15 = arith.maximumf %13, %14 : vector<16x128xf32>
    %16 = arith.truncf %15 : vector<16x128xf32> to vector<16x128xbf16>
    %c0_12 = arith.constant 0 : index
    %c0_13 = arith.constant 0 : index
    %17 = vector.load %arg6[%c0_12, %c0_13] : memref<128x128xbf16, #tpu.memory_space<vmem>>, vector<128x128xbf16>
    %cst_14 = arith.constant dense<0.000000e+00> : vector<16x128xf32>
    %18 = tpu.matmul %16, %17, %cst_14 {dimension_numbers = #tpu.dot_dimension_numbers<[1], [0], [0], [1], [0, 0, 1, 1], [], []>} : vector<16x128xbf16>, vector<128x128xbf16>, vector<16x128xf32> -> vector<16x128xf32>
    %c0_15 = arith.constant 0 : index
    %c0_16 = arith.constant 0 : index
    %19 = vector.load %arg7[%c0_15, %c0_16] : memref<1x128xf32, #tpu.memory_space<vmem>>, vector<1x128xf32>
    %20 = vector.broadcast %19 : vector<1x128xf32> to vector<16x128xf32>
    %21 = arith.addf %18, %20 : vector<16x128xf32>
    %cst_17 = arith.constant 0.000000e+00 : f32
    %22 = vector.broadcast %cst_17 : f32 to vector<16x128xf32>
    %23 = arith.maximumf %21, %22 : vector<16x128xf32>
    %24 = arith.truncf %23 : vector<16x128xf32> to vector<16x128xbf16>
    %c0_18 = arith.constant 0 : index
    %c0_19 = arith.constant 0 : index
    %25 = vector.load %arg8[%c0_18, %c0_19] : memref<128x128xbf16, #tpu.memory_space<vmem>>, vector<128x128xbf16>
    %cst_20 = arith.constant dense<0.000000e+00> : vector<16x128xf32>
    %26 = tpu.matmul %24, %25, %cst_20 {dimension_numbers = #tpu.dot_dimension_numbers<[1], [0], [0], [1], [0, 0, 1, 1], [], []>} : vector<16x128xbf16>, vector<128x128xbf16>, vector<16x128xf32> -> vector<16x128xf32>
    %c0_21 = arith.constant 0 : index
    %c0_22 = arith.constant 0 : index
    %27 = vector.load %arg9[%c0_21, %c0_22] : memref<1x128xf32, #tpu.memory_space<vmem>>, vector<1x128xf32>
    %28 = vector.broadcast %27 : vector<1x128xf32> to vector<16x128xf32>
    %29 = arith.addf %26, %28 : vector<16x128xf32>
    %c0_23 = arith.constant 0 : index
    %c0_24 = arith.constant 0 : index
    %30 = memref.load %arg10[%c0_23, %c0_24] : memref<1x1xf32, #tpu.memory_space<smem>>
    %31 = vector.broadcast %30 : f32 to vector<16x128xf32>
    %32 = arith.mulf %29, %31 : vector<16x128xf32>
    %33 = arith.negf %32 : vector<16x128xf32>
    %34 = math.exp %33 : vector<16x128xf32>
    %cst_25 = arith.constant 1.000000e+00 : f32
    %35 = vector.broadcast %cst_25 : f32 to vector<16x128xf32>
    %36 = arith.addf %35, %34 : vector<16x128xf32>
    %37 = arith.divf %35, %36 : vector<16x128xf32>
    %38 = arith.truncf %37 : vector<16x128xf32> to vector<16x128xbf16>
    %c0_26 = arith.constant 0 : index
    %c0_27 = arith.constant 0 : index
    %39 = vector.load %arg11[%c0_26, %c0_27] : memref<16x128xbf16, #tpu.memory_space<vmem>>, vector<16x128xbf16>
    tpu.vector_store %arg11[%c0_26, %c0_27], %38 {strides = array<i32>} : memref<16x128xbf16, #tpu.memory_space<vmem>>, vector<16x128xbf16>,
    return
  }
  func.func @transform_0(%arg0: i32) -> (i32, i32) {
    %c0_i32 = arith.constant 0 : i32
    %c0_i32_0 = arith.constant 0 : i32
    return %arg0, %c0_i32 : i32, i32
  }
  func.func @transform_1(%arg0: i32) -> (i32, i32) {
    %c0_i32 = arith.constant 0 : i32
    %c0_i32_0 = arith.constant 0 : i32
    %c0_i32_1 = arith.constant 0 : i32
    return %c0_i32, %c0_i32_0 : i32, i32
  }
  func.func @transform_2(%arg0: i32) -> (i32, i32) {
    %c0_i32 = arith.constant 0 : i32
    %c0_i32_0 = arith.constant 0 : i32
    %c0_i32_1 = arith.constant 0 : i32
    return %c0_i32, %c0_i32_0 : i32, i32
  }
  func.func @transform_3(%arg0: i32) -> (i32, i32) {
    %c0_i32 = arith.constant 0 : i32
    %c0_i32_0 = arith.constant 0 : i32
    %c0_i32_1 = arith.constant 0 : i32
    return %c0_i32, %c0_i32_0 : i32, i32
  }
  func.func @transform_4(%arg0: i32) -> (i32, i32) {
    %c0_i32 = arith.constant 0 : i32
    %c0_i32_0 = arith.constant 0 : i32
    %c0_i32_1 = arith.constant 0 : i32
    return %c0_i32, %c0_i32_0 : i32, i32
  }
  func.func @transform_5(%arg0: i32) -> (i32, i32) {
    %c0_i32 = arith.constant 0 : i32
    %c0_i32_0 = arith.constant 0 : i32
    %c0_i32_1 = arith.constant 0 : i32
    return %c0_i32, %c0_i32_0 : i32, i32
  }
  func.func @transform_6(%arg0: i32) -> (i32, i32) {
    %c0_i32 = arith.constant 0 : i32
    %c0_i32_0 = arith.constant 0 : i32
    %c0_i32_1 = arith.constant 0 : i32
    return %c0_i32, %c0_i32_0 : i32, i32
  }
  func.func @transform_7(%arg0: i32) -> (i32, i32) {
    %c0_i32 = arith.constant 0 : i32
    %c0_i32_0 = arith.constant 0 : i32
    %c0_i32_1 = arith.constant 0 : i32
    return %c0_i32, %c0_i32_0 : i32, i32
  }
  func.func @transform_8(%arg0: i32) -> (i32, i32) {
    %c0_i32 = arith.constant 0 : i32
    %c0_i32_0 = arith.constant 0 : i32
    %c0_i32_1 = arith.constant 0 : i32
    return %c0_i32, %c0_i32_0 : i32, i32
  }
  func.func @transform_9(%arg0: i32) -> (i32, i32) {
    %c0_i32 = arith.constant 0 : i32
    %c0_i32_0 = arith.constant 0 : i32
    %c0_i32_1 = arith.constant 0 : i32
    return %c0_i32, %c0_i32_0 : i32, i32
  }
  func.func @transform_10(%arg0: i32) -> (i32, i32) {
    %c0_i32 = arith.constant 0 : i32
    %c0_i32_0 = arith.constant 0 : i32
    return %arg0, %c0_i32 : i32, i32
  }
}

</mosaic_0001>

<bundles_post_ra>
// kernel: tpu_custom_call.1
= control target key start
LH: loop header
LB: loop body
LE: loop exit
PB: predicated region body
PF: predicated region fallthrough
CT: control target
= control target key end

     0   :  { %16 = vsyncpa [#allocation4], 0  ;;  %s985_s0 = inlined_call_operand.hbm [shape: bf16[16,128], index: 0, kind: input, shape index: {}]   ;;  %s986_s1 = inlined_call_operand.hbm [shape: bf16[128,128], index: 1, kind: input, shape index: {}]   ;;  %s987_s2 = inlined_call_operand.vmem [shape: f32[1,128], index: 2, kind: input, shape index: {}]   ;;  %s988_s3 = inlined_call_operand.hbm [shape: bf16[128,128], index: 3, kind: input, shape index: {}]   ;;  %s989_s4 = inlined_call_operand.vmem [shape: f32[1,128], index: 4, kind: input, shape index: {}]   ;;  %s990_s5 = inlined_call_operand.hbm [shape: bf16[128,128], index: 5, kind: input, shape index: {}]   ;;  %s991_s6 = inlined_call_operand.vmem [shape: f32[1,128], index: 6, kind: input, shape index: {}]   ;;  %s992_s7 = inlined_call_operand.hbm [shape: bf16[128,128], index: 7, kind: input, shape index: {}]   ;;  %s993_s8 = inlined_call_operand.vmem [shape: f32[1,128], index: 8, kind: input, shape index: {}]   ;;  %s994_s9 = inlined_call_operand.<no memory space> [shape: f32[1,1], index: 9, kind: input, shape index: {}]   ;;  %s995_s10 = inlined_call_operand.hbm [shape: bf16[16,128], index: 10, kind: output, shape index: {}]  }
   0x1   :  { %17 = vsyncpa [#allocation7], 0 }
   0x2   :  { %18 = vsyncpa [#allocation10], 0 }
   0x3   :  { %19 = vsyncpa [#allocation5], 0  ;;  %s37_s15 = sshll.u32 %s986_s1, 4  ;;  %s871_s16 = smov [#allocation6]   ;;  %s38_s15 = int_to_ptr.hbm [resolvable:$true] %s37_s15 }
   0x4   :  { %s39_s17 = sshll.u32 %s871_s16, 4  ;;  %s67_s20 = sshll.u32 %s990_s5, 4  ;;  %s40_s17 = int_to_ptr.vmem [resolvable:$true] %s39_s17  ;;  %s68_s20 = int_to_ptr.hbm [resolvable:$true] %s67_s20 }
   0x5   :  { %s872_s21 = smov 64   ;;  %s873_s22 = smov 4  }
   0x6   :  { %45 = dma.hbm_to_vmem [thread:$0]  %s38_s15, 1024, %s40_s17, [#allocation7], %s872_s21, %s872_s21, %s873_s22  }
   0x7   :  { %s874_s23 = smov [#allocation9]   ;;  %s24_s1 = sshll.u32 %s985_s0, 4  ;;  %s25_s1 = int_to_ptr.hbm [resolvable:$true] %s24_s1 }
   0x8   :  { %s69_s24 = sshll.u32 %s874_s23, 4  ;;  %s52_s28 = sshll.u32 %s988_s3, 4  ;;  %s70_s24 = int_to_ptr.vmem [resolvable:$true] %s69_s24  ;;  %s53_s28 = int_to_ptr.hbm [resolvable:$true] %s52_s28 }
   0x9   :  { %75 = dma.hbm_to_vmem [thread:$0]  %s68_s20, 1024, %s70_s24, [#allocation10], %s872_s21, %s872_s21, %s873_s22  }
   0xa   :  { %s875_s29 = smov [#allocation3]   ;;  %s876_s11 = smov [#allocation8]  }
   0xb   :  { %s26_s30 = sshll.u32 %s875_s29, 4  ;;  %s54_s0 = sshll.u32 %s876_s11, 4  ;;  %s27_s30 = int_to_ptr.vmem [resolvable:$true] %s26_s30  ;;  %s55_s0 = int_to_ptr.vmem [resolvable:$true] %s54_s0 }
   0xc   :  { %32 = dma.hbm_to_vmem [thread:$0]  %s25_s1, 128, %s27_s30, [#allocation4], %s872_s21, %s872_s21, %s873_s22  }
   0xd   :  { %s82_s14 = sshll.u32 %s992_s7, 4  ;;  %s877_s3 = smov [#allocation11]   ;;  %s83_s14 = int_to_ptr.hbm [resolvable:$true] %s82_s14 }
   0xe   :  { %60 = dma.hbm_to_vmem [thread:$0]  %s53_s28, 1024, %s55_s0, [#allocation7], %s872_s21, %s872_s21, %s873_s22  }
   0xf   :  { %s84_s15 = sshll.u32 %s877_s3, 4  ;;  %s85_s15 = int_to_ptr.vmem [resolvable:$true] %s84_s15 }
  0x10   :  { %90 = dma.hbm_to_vmem [thread:$0]  %s83_s14, 1024, %s85_s15, [#allocation10], %s872_s21, %s872_s21, %s873_s22  }
  0x11   :  { %863 = dma.done.wait [#allocation4], 128  }
  0x12   :  { %864 = vsyncadd [#allocation4], 4294967168 }
  0x13   :  { %865 = dma.done.wait [#allocation7], 2048  }
  0x14   :  { %866 = vsyncadd [#allocation7], 4294965248 }
  0x15   :  { %867 = dma.done.wait [#allocation10], 2048  }
  0x16   :  { %868 = vsyncadd [#allocation10], 4294965248  ;;  %v669_v0 = vld [vmem:[#allocation6 + $0x38] sm:$0xff]  ;;  %v668_v1 = vld [vmem:[#allocation6 + $0x30] sm:$0xff]  ;;  %v461_v59 = vstv %s994_s9  ;;  %s512_s26 = sshll.u32 %s995_s10, 4  ;;  %s513_s26 = int_to_ptr.hbm [resolvable:$true] %s512_s26 }
  0x17   :  { %191 = vmatpush.bf16.msra.mxu0 %v669_v0  ;;  %v677_v2 = vld [vmem:[#allocation8 + $0x38] sm:$0xff]  ;;  %v676_v3 = vld [vmem:[#allocation8 + $0x30] sm:$0xff]  ;;  %v667_v4 = vld [vmem:[#allocation6 + $0x28] sm:$0xff] }
  0x18   :  { %276 = vmatpush.bf16.msra.mxu1 %v677_v2  ;;  %v675_v5 = vld [vmem:[#allocation8 + $0x28] sm:$0xff]  ;;  %v666_v6 = vld [vmem:[#allocation6 + $0x20] sm:$0xff]  ;;  %v665_v8 = vld [vmem:[#allocation6 + $0x18] sm:$0xff] }
  0x19   :  { %v674_v7 = vld [vmem:[#allocation8 + $0x20] sm:$0xff]  ;;  %v664_v9 = vld [vmem:[#allocation6 + $0x10] sm:$0xff]  ;;  %v663_v10 = vld [vmem:[#allocation6 + $0x8] sm:$0xff] }
  0x1a   :  { %v662_v11 = vld [vmem:[#allocation6] sm:$0xff]  ;;  %v661_v12 = vld [vmem:[#allocation3] sm:$0xff]  ;;  %v672_v14 = vld [vmem:[#allocation8 + $0x10] sm:$0xff] }
  0x1b   :  { %192 = vmatpush.bf16.msra.mxu0 %v668_v1  ;;  %v673_v13 = vld [vmem:[#allocation8 + $0x18] sm:$0xff]  ;;  %v671_v15 = vld [vmem:[#allocation8 + $0x8] sm:$0xff]  ;;  %v670_v16 = vld [vmem:[#allocation8] sm:$0xff] }
  0x1c   :  { %277 = vmatpush.bf16.msra.mxu1 %v676_v3  ;;  %v685_v17 = vld [vmem:[#allocation9 + $0x38] sm:$0xff]  ;;  %v684_v18 = vld [vmem:[#allocation9 + $0x30] sm:$0xff]  ;;  %v683_v19 = vld [vmem:[#allocation9 + $0x28] sm:$0xff] }
  0x1d   :  { %361 = vmatpush.bf16.msra.mxu2 %v685_v17  ;;  %v682_v20 = vld [vmem:[#allocation9 + $0x20] sm:$0xff]  ;;  %v707_v22 = vld [vmem:[%s987_s2] ss:$0 sm:$0xff]  ;;  %v680_v30 = vld [vmem:[#allocation9 + $0x10] sm:$0xff] }
  0x1e   :  { %v681_v29 = vld [vmem:[#allocation9 + $0x18] sm:$0xff]  ;;  %v679_v31 = vld [vmem:[#allocation9 + $0x8] sm:$0xff]  ;;  %v678_v32 = vld [vmem:[#allocation9] sm:$0xff] }
  0x1f   :  { %193 = vmatpush.bf16.msra.mxu0 %v667_v4  ;;  %v693_v33 = vld [vmem:[#allocation11 + $0x38] sm:$0xff]  ;;  %v692_v34 = vld [vmem:[#allocation11 + $0x30] sm:$0xff]  ;;  %v691_v35 = vld [vmem:[#allocation11 + $0x28] sm:$0xff] }
  0x20   :  { %278 = vmatpush.bf16.msra.mxu1 %v675_v5  ;;  %446 = vmatpush.bf16.msra.mxu3 %v693_v33  ;;  %v690_v36 = vld [vmem:[#allocation11 + $0x20] sm:$0xff]  ;;  %v708_v38 = vld [vmem:[%s989_s4] ss:$0 sm:$0xff]  ;;  %v688_v46 = vld [vmem:[#allocation11 + $0x10] sm:$0xff] }
  0x21   :  { %362 = vmatpush.bf16.msra.mxu2 %v684_v18  ;;  %v689_v45 = vld [vmem:[#allocation11 + $0x18] sm:$0xff]  ;;  %v687_v47 = vld [vmem:[#allocation11 + $0x8] sm:$0xff]  ;;  %v686_v48 = vld [vmem:[#allocation11] sm:$0xff] }
  0x22   :  { %v709_v50 = vld [vmem:[%s991_s6] ss:$0 sm:$0xff]  ;;  %s878_s6 = smov [#allocation12]  }
  0x23   :  { %194 = vmatpush.bf16.msra.mxu0 %v666_v6  ;;  %v710_v57 = vld [vmem:[%s993_s8] ss:$0 sm:$0xff]  ;;  %s510_s8 = sshll.u32 %s878_s6, 4  ;;  %s511_s8 = int_to_ptr.vmem [resolvable:$true] %s510_s8 }
  0x24   :  { %279 = vmatpush.bf16.msra.mxu1 %v674_v7  ;;  %447 = vmatpush.bf16.msra.mxu3 %v692_v34 }
  0x25   :  { %363 = vmatpush.bf16.msra.mxu2 %v683_v19 }
  0x27   :  { %195 = vmatpush.bf16.msra.mxu0 %v665_v8 }
  0x28   :  { %280 = vmatpush.bf16.msra.mxu1 %v673_v13  ;;  %448 = vmatpush.bf16.msra.mxu3 %v691_v35 }
  0x29   :  { %364 = vmatpush.bf16.msra.mxu2 %v682_v20 }
  0x2b   :  { %196 = vmatpush.bf16.msra.mxu0 %v664_v9 }
  0x2c   :  { %281 = vmatpush.bf16.msra.mxu1 %v672_v14  ;;  %449 = vmatpush.bf16.msra.mxu3 %v690_v36 }
  0x2d   :  { %365 = vmatpush.bf16.msra.mxu2 %v681_v29 }
  0x2f   :  { %197 = vmatpush.bf16.msra.mxu0 %v663_v10 }
  0x30   :  { %282 = vmatpush.bf16.msra.mxu1 %v671_v15  ;;  %450 = vmatpush.bf16.msra.mxu3 %v689_v45 }
  0x31   :  { %366 = vmatpush.bf16.msra.mxu2 %v680_v30 }
  0x33   :  { %198 = vmatpush.bf16.msra.mxu0 %v662_v11 }
  0x34   :  { %283 = vmatpush.bf16.msra.mxu1 %v670_v16  ;;  %451 = vmatpush.bf16.msra.mxu3 %v688_v46 }
  0x35   :  { %367 = vmatpush.bf16.msra.mxu2 %v679_v31 }
  0x36   :  { %199 = vmatmul.bf16.vlgmr.msra.gmra.mxu0 %v661_v12 }
  0x38   :  { %452 = vmatpush.bf16.msra.mxu3 %v687_v47 }
  0x39   :  { %368 = vmatpush.bf16.msra.mxu2 %v678_v32 }
  0x3c   :  { %453 = vmatpush.bf16.msra.mxu3 %v686_v48 }
  0xb3   :  { %v200_v21 = vpop.f32.mrf.mxu0 }
  0xb4   :  { %v201_v23 = vadd.f32 %v707_v22, %v200_v21 }
  0xb6   :  { %v205_v26 = vmax.f32 %v201_v23, 0.0 }
  0xbb   :  { %v202_v24 = vpop.f32.mrf.mxu0 }
  0xbc   :  { %v203_v25 = vadd.f32 %v707_v22, %v202_v24 }
  0xbe   :  { %v206_v27 = vmax.f32 %v203_v25, 0.0 }
  0xc0   :  { %v207_v28 = vpack.c.bf16 %v206_v27, %v205_v26 }
  0xc2   :  { %284 = vmatmul.bf16.vlgmr.msra.gmra.mxu1 %v207_v28 }
 0x13f   :  { %v285_v37 = vpop.f32.mrf.mxu1 }
 0x140   :  { %v286_v39 = vadd.f32 %v708_v38, %v285_v37 }
 0x142   :  { %v290_v42 = vmax.f32 %v286_v39, 0.0 }
 0x147   :  { %v287_v40 = vpop.f32.mrf.mxu1 }
 0x148   :  { %v288_v41 = vadd.f32 %v708_v38, %v287_v40 }
 0x14a   :  { %v291_v43 = vmax.f32 %v288_v41, 0.0 }
 0x14c   :  { %v292_v44 = vpack.c.bf16 %v291_v43, %v290_v42 }
 0x14e   :  { %369 = vmatmul.bf16.vlgmr.msra.gmra.mxu2 %v292_v44 }
 0x1d1   :  { %v370_v49 = vpop.f32.mrf.mxu2 }
 0x1d2   :  { %v371_v51 = vadd.f32 %v709_v50, %v370_v49 }
 0x1d4   :  { %v375_v54 = vmax.f32 %v371_v51, 0.0 }
 0x1d9   :  { %v372_v52 = vpop.f32.mrf.mxu2 }
 0x1da   :  { %v373_v53 = vadd.f32 %v709_v50, %v372_v52 }
 0x1dc   :  { %v376_v55 = vmax.f32 %v373_v53, 0.0 }
 0x1de   :  { %v377_v56 = vpack.c.bf16 %v376_v55, %v375_v54 }
 0x1e0   :  { %454 = vmatmul.bf16.vlgmr.msra.gmra.mxu3 %v377_v56 }
 0x263   :  { %v455_v58 = vpop.f32.mrf.mxu3 }
 0x264   :  { %v456_v60 = vadd.f32 %v710_v57, %v455_v58 }
 0x266   :  { %v462_v61 = vmul.f32 %v461_v59, %v456_v60 }
 0x268   :  { %v659_v62 = vmul.f32 -1.442695, %v462_v61 }
 0x26a   :  { %711 = vpow2.f32 %v659_v62 }
 0x26b   :  { %v457_v63 = vpop.f32.mrf.mxu3 }
 0x26c   :  { %v458_v0 = vadd.f32 %v710_v57, %v457_v63 }
 0x26e   :  { %v463_v1 = vmul.f32 %v461_v59, %v458_v0 }
 0x270   :  { %v712_v2 = vpop.eup %711  ;;  %v660_v3 = vmul.f32 -1.442695, %v463_v1 }
 0x271   :  { %v470_v4 = vadd.f32 1.0, %v712_v2 }
 0x272   :  { %713 = vpow2.f32 %v660_v3 }
 0x273   :  { %715 = vrcp.f32 %v470_v4  ;;  %vm477_vm1 = vweird.f32 %v470_v4  ;;  %v483_v15 = vand.u32 2147483648, %v470_v4  ;;  %v481_v17 = vand.u32 2147483647, %v470_v4 }
 0x275   :  { %v484_v22 = vor.u32 1.1754944e-38, %v483_v15  ;;  %vm482_vm6 = vcmp.eq.f32.partialorder %v481_v17, 8.507059e+37 }
 0x278   :  { %v714_v5 = vpop.eup %713 }
 0x279   :  { %v716_v6 = vpop.eup %715  ;;  %v471_v7 = vadd.f32 1.0, %v714_v5 }
 0x27a   :  { %v473_v8 = vmul.f32 %v716_v6, %v470_v4  ;;  %vm478_vm0 = vweird.f32 %v716_v6 }
 0x27b   :  { %717 = vrcp.f32 %v471_v7  ;;  %v498_v16 = vand.u32 2147483648, %v471_v7  ;;  %v496_v19 = vand.u32 2147483647, %v471_v7  ;;  %vm479_vm3 = vmor %vm477_vm1, %vm478_vm0  ;;  %vm492_vm4 = vweird.f32 %v471_v7 }
 0x27c   :  { %v474_v9 = vsub.f32 1.0, %v473_v8 }
 0x27d   :  { %v499_v23 = vor.u32 1.1754944e-38, %v498_v16  ;;  %vm497_vm7 = vcmp.eq.f32.partialorder %v496_v19, 8.507059e+37 }
 0x27e   :  { %v475_v10 = vmul.f32 %v716_v6, %v474_v9 }
 0x280   :  { %v476_v13 = vadd.f32 %v716_v6, %v475_v10 }
 0x281   :  { %v718_v11 = vpop.eup %717 }
 0x282   :  { %v488_v12 = vmul.f32 %v718_v11, %v471_v7  ;;  %vm493_vm2 = vweird.f32 %v718_v11  ;;  %v480_v20 = vsel %vm479_vm3, %v716_v6, %v476_v13 }
 0x283   :  { %vm494_vm5 = vmor %vm492_vm4, %vm493_vm2  ;;  %v485_v25 = vsel %vm482_vm6, %v484_v22, %v480_v20 }
 0x284   :  { %v489_v14 = vsub.f32 1.0, %v488_v12 }
 0x286   :  { %v490_v18 = vmul.f32 %v718_v11, %v489_v14 }
 0x288   :  { %v491_v21 = vadd.f32 %v718_v11, %v490_v18 }
 0x28a   :  { %v495_v24 = vsel %vm494_vm5, %v718_v11, %v491_v21 }
 0x28b   :  { %v500_v26 = vsel %vm497_vm7, %v499_v23, %v495_v24 }
 0x28c   :  { %v697_v27 = vpack.c.bf16 %v500_v26, %v485_v25 }
 0x28e   :  { %698 = vst [vmem:[#allocation12] sm:$0xff] %v697_v27  }
 0x28f   :  { %518 = dma.vmem_to_hbm [thread:$0]  %s511_s8, 128, %s513_s26, [#allocation5], %s872_s21, %s872_s21, %s873_s22  }
 0x290   :  { %869 = dma.done.wait [#allocation5], 128  }
 0x291   :  { %870 = vsyncadd [#allocation5], 4294967168 }
 0x292   :  { %523 = vsyncpa [#allocation4], 1 }
 0x293   :  { %524 = vsyncpa [#allocation7], 1 }
 0x294   :  { %525 = vsyncpa [#allocation10], 1 }
 0x295   :  { %526 = vsyncpa [#allocation5], 1 }

</bundles_post_ra>
